<compile_context>
chip_gen: v7x
topology: tpu7x:2x2x1
jax: 0.10.0
libtpu: 0.0.40
codegen_flags: <defaults>
</compile_context>

<pallas_src>
import math

import jax
import jax.numpy as jnp
from jax.experimental import pallas as pl
from jax.experimental.pallas import tpu as pltpu

# --- problem sizes (small, consistent with the module's forward) ---------
BATCH = 8
OBS_DIM = 16
D_MODEL = 32
N_ACTIONS = 6          # env.action_space.n for the (discrete) selected env
NUM_TASKS = 2
TASK_ID = 0            # task_id_int_dict lookup is host-side / static


# ------------------------------ kernel -----------------------------------
def twinq_kernel(s_ref, wf_ref, wb_ref, wd_ref, b_ref, out_ref):
    """Fused twin-Q forward.

    s_ref  : [B, OBS_DIM]           observations
    wf_ref : [OBS_DIM, 2*D]         obs-encoder first-layer weights (Q1 | Q2)
    wb_ref : [7, 2*D, 2*D]          block-diagonal hidden weights
                                    (obs_h, obs_out, shr_in, shr_h, shr_out,
                                     dec_in, dec_h)
    wd_ref : [2*D, 2*N_ACTIONS]     block-diagonal decoder output weights
    b_ref  : [9, 2*D]               bias slab (row 3 has the task embedding
                                    folded in, row 8 is the padded decoder
                                    output bias)
    out_ref: [B, N_ACTIONS]         min(Q1, Q2)
    """

    def bias(i):
        return b_ref[i:i + 1, :]                 # [1, 2D] -> broadcast over batch

    def mm(x, w):
        return jnp.dot(x, w, preferred_element_type=jnp.float32)

    s = s_ref[...]

    # --- obs encoder (ResidualMLP), both nets side by side in lanes ---
    h = jnp.maximum(mm(s, wf_ref[...]) + bias(0), 0.0)
    h = h + jnp.maximum(mm(h, wb_ref[0]) + bias(1), 0.0)
    h = mm(h, wb_ref[1]) + bias(2)
    h = jnp.maximum(h, 0.0)                      # act(obs_encoder(s))

    # task embedding add is folded into bias(3) host-side

    # --- shared_mlp (ResidualMLP) ---
    g = jnp.maximum(mm(h, wb_ref[2]) + bias(3), 0.0)
    g = g + jnp.maximum(mm(g, wb_ref[3]) + bias(4), 0.0)
    g = mm(g, wb_ref[4]) + bias(5)
    g = jnp.maximum(g, 0.0)                      # act(shared_mlp(h))

    # --- value decoder (ResidualMLP -> n_actions per net) ---
    d = jnp.maximum(mm(g, wb_ref[5]) + bias(6), 0.0)
    d = d + jnp.maximum(mm(d, wb_ref[6]) + bias(7), 0.0)
    b_dec = bias(8)[:, :2 * N_ACTIONS]
    q = mm(d, wd_ref[...]) + b_dec               # [B, 2*N_ACTIONS]  (Q1 | Q2)

    out_ref[...] = jnp.minimum(q[:, :N_ACTIONS], q[:, N_ACTIONS:])


# ------------------------------- wrapper ----------------------------------
def twin_q_forward(s, packed):
    w_first, w_block, w_dec, b_slab = packed
    vmem = pl.BlockSpec(memory_space=pltpu.MemorySpace.VMEM)
    return pl.pallas_call(
        twinq_kernel,
        out_shape=jax.ShapeDtypeStruct((s.shape[0], N_ACTIONS), jnp.float32),
        in_specs=[vmem] * 5,
        out_specs=vmem,
    )(s, w_first, w_block, w_dec, b_slab)


# ---------------------------- parameter init ------------------------------
def _init_linear(key, fan_in, fan_out):
    k1, k2 = jax.random.split(key)
    bound = 1.0 / math.sqrt(fan_in)
    w = jax.random.uniform(k1, (fan_in, fan_out), jnp.float32, -bound, bound)
    b = jax.random.uniform(k2, (fan_out,), jnp.float32, -bound, bound)
    return w, b


def _init_resmlp(key, in_dim, out_dim):
    k = jax.random.split(key, 3)
    w_in, b_in = _init_linear(k[0], in_dim, D_MODEL)
    w_h, b_h = _init_linear(k[1], D_MODEL, D_MODEL)
    w_out, b_out = _init_linear(k[2], D_MODEL, out_dim)
    return [w_in, b_in, w_h, b_h, w_out, b_out]


def init_qnet(key):
    k = jax.random.split(key, 4)
    emb = jax.random.normal(k[0], (NUM_TASKS, D_MODEL), jnp.float32)   # nn.Embedding
    params = (_init_resmlp(k[1], OBS_DIM, D_MODEL)      # encoders_dict[env_id]
              + _init_resmlp(k[2], D_MODEL, D_MODEL)    # shared_mlp
              + _init_resmlp(k[3], D_MODEL, N_ACTIONS)) # value_decoder_dict[env_id]
    return emb, params


# ------------------------- host-side slab packing --------------------------
def pack_twin_params(emb1, p1, emb2, p2, task_id):
    """Pack both Q-nets into 4 contiguous, lane-concatenated slabs."""
    def bd(w1, w2):  # block-diagonal [2D, *]
        z12 = jnp.zeros((w1.shape[0], w2.shape[1]), w1.dtype)
        z21 = jnp.zeros((w2.shape[0], w1.shape[1]), w2.dtype)
        return jnp.block([[w1, z12], [z21, w2]])

    o1, s1, d1 = p1[0:6], p1[6:12], p1[12:18]
    o2, s2, d2 = p2[0:6], p2[6:12], p2[12:18]

    w_first = jnp.concatenate([o1[0], o2[0]], axis=1)          # [OBS, 2D]
    w_block = jnp.stack([
        bd(o1[2], o2[2]),   # obs hidden
        bd(o1[4], o2[4]),   # obs out
        bd(s1[0], s2[0]),   # shared in
        bd(s1[2], s2[2]),   # shared hidden
        bd(s1[4], s2[4]),   # shared out
        bd(d1[0], d2[0]),   # decoder in
        bd(d1[2], d2[2]),   # decoder hidden
    ])                                                          # [7, 2D, 2D]
    w_dec = bd(d1[4], d2[4])                                    # [2D, 2*N_ACT]

    # fold task embedding into shared_mlp first-layer bias: (h+te)@W+b = h@W+(te@W+b)
    te1 = emb1[task_id]
    te2 = emb2[task_id]
    shr_b1 = te1 @ s1[0] + s1[1]
    shr_b2 = te2 @ s2[0] + s2[1]

    dec_out_b = jnp.concatenate([d1[5], d2[5]])
    dec_out_b = jnp.pad(dec_out_b, (0, 2 * D_MODEL - dec_out_b.shape[0]))

    b_slab = jnp.stack([
        jnp.concatenate([o1[1], o2[1]]),
        jnp.concatenate([o1[3], o2[3]]),
        jnp.concatenate([o1[5], o2[5]]),
        jnp.concatenate([shr_b1, shr_b2]),
        jnp.concatenate([s1[3], s2[3]]),
        jnp.concatenate([s1[5], s2[5]]),
        jnp.concatenate([d1[1], d2[1]]),
        jnp.concatenate([d1[3], d2[3]]),
        dec_out_b,
    ])                                                          # [9, 2D]
    return w_first, w_block, w_dec, b_slab


# --------------------------- pure-JAX reference ---------------------------
def _ref_resmlp(x, p):
    h = jnp.maximum(x @ p[0] + p[1], 0.0)
    h = h + jnp.maximum(h @ p[2] + p[3], 0.0)
    return h @ p[4] + p[5]


def _ref_q(s, emb, params, task_id):
    obs_p, shr_p, dec_p = params[0:6], params[6:12], params[12:18]
    h = jnp.maximum(_ref_resmlp(s, obs_p), 0.0)
    h = h + emb[task_id]
    h = jnp.maximum(_ref_resmlp(h, shr_p), 0.0)
    return _ref_resmlp(h, dec_p)


if __name__ == "__main__":
    key = jax.random.PRNGKey(0)
    k_s, k_q1, k_q2 = jax.random.split(key, 3)

    s = jax.random.normal(k_s, (BATCH, OBS_DIM), jnp.float32)

    emb1, p1 = init_qnet(k_q1)
    emb2, p2 = init_qnet(k_q2)

    packed = pack_twin_params(emb1, p1, emb2, p2, TASK_ID)
    out = twin_q_forward(s, packed)
    out = jax.block_until_ready(out)

    ref = jnp.minimum(_ref_q(s, emb1, p1, TASK_ID),
                      _ref_q(s, emb2, p2, TASK_ID))
    assert out.shape == (BATCH, N_ACTIONS)
    assert jnp.allclose(out, ref, atol=1e-3, rtol=1e-3)

    print("KERNEL_OK")
</pallas_src>

<mosaic_0001>
module attributes {stable_mosaic.version = 11 : i64} {
  func.func @twinq_kernel(%arg0: memref<8x16xf32, #tpu.memory_space<vmem>>, %arg1: memref<16x64xf32, #tpu.memory_space<vmem>>, %arg2: memref<7x64x64xf32, #tpu.memory_space<vmem>>, %arg3: memref<64x12xf32, #tpu.memory_space<vmem>>, %arg4: memref<9x64xf32, #tpu.memory_space<vmem>>, %arg5: memref<8x6xf32, #tpu.memory_space<vmem>>) attributes {dimension_semantics = [], scalar_prefetch = 0 : i64, scratch_operands = 0 : i64, tpu.core_type = #tpu.core_type<tc>} {
    %c0 = arith.constant 0 : index
    %c0_0 = arith.constant 0 : index
    %0 = vector.load %arg0[%c0, %c0_0] : memref<8x16xf32, #tpu.memory_space<vmem>>, vector<8x16xf32>
    %c0_1 = arith.constant 0 : index
    %c0_2 = arith.constant 0 : index
    %1 = vector.load %arg1[%c0_1, %c0_2] : memref<16x64xf32, #tpu.memory_space<vmem>>, vector<16x64xf32>
    %cst = arith.constant dense<0.000000e+00> : vector<8x64xf32>
    %2 = tpu.matmul %0, %1, %cst {dimension_numbers = #tpu.dot_dimension_numbers<[1], [0], [0], [1], [0, 0, 1, 1], [], []>} : vector<8x16xf32>, vector<16x64xf32>, vector<8x64xf32> -> vector<8x64xf32>
    %c0_3 = arith.constant 0 : index
    %c0_4 = arith.constant 0 : index
    %3 = vector.load %arg4[%c0_3, %c0_4] : memref<9x64xf32, #tpu.memory_space<vmem>>, vector<1x64xf32>
    %4 = vector.broadcast %3 : vector<1x64xf32> to vector<8x64xf32>
    %5 = arith.addf %2, %4 : vector<8x64xf32>
    %cst_5 = arith.constant 0.000000e+00 : f32
    %6 = vector.broadcast %cst_5 : f32 to vector<8x64xf32>
    %7 = arith.maximumf %5, %6 : vector<8x64xf32>
    %c0_6 = arith.constant 0 : index
    %c0_7 = arith.constant 0 : index
    %c0_8 = arith.constant 0 : index
    %8 = vector.load %arg2[%c0_6, %c0_7, %c0_8] : memref<7x64x64xf32, #tpu.memory_space<vmem>>, vector<1x64x64xf32>
    %9 = vector.shape_cast %8 : vector<1x64x64xf32> to vector<64x64xf32>
    %cst_9 = arith.constant dense<0.000000e+00> : vector<8x64xf32>
    %10 = tpu.matmul %7, %9, %cst_9 {dimension_numbers = #tpu.dot_dimension_numbers<[1], [0], [0], [1], [0, 0, 1, 1], [], []>} : vector<8x64xf32>, vector<64x64xf32>, vector<8x64xf32> -> vector<8x64xf32>
    %c1 = arith.constant 1 : index
    %c0_10 = arith.constant 0 : index
    %11 = vector.load %arg4[%c1, %c0_10] : memref<9x64xf32, #tpu.memory_space<vmem>>, vector<1x64xf32>
    %12 = vector.broadcast %11 : vector<1x64xf32> to vector<8x64xf32>
    %13 = arith.addf %10, %12 : vector<8x64xf32>
    %cst_11 = arith.constant 0.000000e+00 : f32
    %14 = vector.broadcast %cst_11 : f32 to vector<8x64xf32>
    %15 = arith.maximumf %13, %14 : vector<8x64xf32>
    %16 = arith.addf %7, %15 : vector<8x64xf32>
    %c1_12 = arith.constant 1 : index
    %c0_13 = arith.constant 0 : index
    %c0_14 = arith.constant 0 : index
    %17 = vector.load %arg2[%c1_12, %c0_13, %c0_14] : memref<7x64x64xf32, #tpu.memory_space<vmem>>, vector<1x64x64xf32>
    %18 = vector.shape_cast %17 : vector<1x64x64xf32> to vector<64x64xf32>
    %cst_15 = arith.constant dense<0.000000e+00> : vector<8x64xf32>
    %19 = tpu.matmul %16, %18, %cst_15 {dimension_numbers = #tpu.dot_dimension_numbers<[1], [0], [0], [1], [0, 0, 1, 1], [], []>} : vector<8x64xf32>, vector<64x64xf32>, vector<8x64xf32> -> vector<8x64xf32>
    %c2 = arith.constant 2 : index
    %c0_16 = arith.constant 0 : index
    %20 = vector.load %arg4[%c2, %c0_16] : memref<9x64xf32, #tpu.memory_space<vmem>>, vector<1x64xf32>
    %21 = vector.broadcast %20 : vector<1x64xf32> to vector<8x64xf32>
    %22 = arith.addf %19, %21 : vector<8x64xf32>
    %cst_17 = arith.constant 0.000000e+00 : f32
    %23 = vector.broadcast %cst_17 : f32 to vector<8x64xf32>
    %24 = arith.maximumf %22, %23 : vector<8x64xf32>
    %c2_18 = arith.constant 2 : index
    %c0_19 = arith.constant 0 : index
    %c0_20 = arith.constant 0 : index
    %25 = vector.load %arg2[%c2_18, %c0_19, %c0_20] : memref<7x64x64xf32, #tpu.memory_space<vmem>>, vector<1x64x64xf32>
    %26 = vector.shape_cast %25 : vector<1x64x64xf32> to vector<64x64xf32>
    %cst_21 = arith.constant dense<0.000000e+00> : vector<8x64xf32>
    %27 = tpu.matmul %24, %26, %cst_21 {dimension_numbers = #tpu.dot_dimension_numbers<[1], [0], [0], [1], [0, 0, 1, 1], [], []>} : vector<8x64xf32>, vector<64x64xf32>, vector<8x64xf32> -> vector<8x64xf32>
    %c3 = arith.constant 3 : index
    %c0_22 = arith.constant 0 : index
    %28 = vector.load %arg4[%c3, %c0_22] : memref<9x64xf32, #tpu.memory_space<vmem>>, vector<1x64xf32>
    %29 = vector.broadcast %28 : vector<1x64xf32> to vector<8x64xf32>
    %30 = arith.addf %27, %29 : vector<8x64xf32>
    %cst_23 = arith.constant 0.000000e+00 : f32
    %31 = vector.broadcast %cst_23 : f32 to vector<8x64xf32>
    %32 = arith.maximumf %30, %31 : vector<8x64xf32>
    %c3_24 = arith.constant 3 : index
    %c0_25 = arith.constant 0 : index
    %c0_26 = arith.constant 0 : index
    %33 = vector.load %arg2[%c3_24, %c0_25, %c0_26] : memref<7x64x64xf32, #tpu.memory_space<vmem>>, vector<1x64x64xf32>
    %34 = vector.shape_cast %33 : vector<1x64x64xf32> to vector<64x64xf32>
    %cst_27 = arith.constant dense<0.000000e+00> : vector<8x64xf32>
    %35 = tpu.matmul %32, %34, %cst_27 {dimension_numbers = #tpu.dot_dimension_numbers<[1], [0], [0], [1], [0, 0, 1, 1], [], []>} : vector<8x64xf32>, vector<64x64xf32>, vector<8x64xf32> -> vector<8x64xf32>
    %c4 = arith.constant 4 : index
    %c0_28 = arith.constant 0 : index
    %36 = vector.load %arg4[%c4, %c0_28] : memref<9x64xf32, #tpu.memory_space<vmem>>, vector<1x64xf32>
    %37 = vector.broadcast %36 : vector<1x64xf32> to vector<8x64xf32>
    %38 = arith.addf %35, %37 : vector<8x64xf32>
    %cst_29 = arith.constant 0.000000e+00 : f32
    %39 = vector.broadcast %cst_29 : f32 to vector<8x64xf32>
    %40 = arith.maximumf %38, %39 : vector<8x64xf32>
    %41 = arith.addf %32, %40 : vector<8x64xf32>
    %c4_30 = arith.constant 4 : index
    %c0_31 = arith.constant 0 : index
    %c0_32 = arith.constant 0 : index
    %42 = vector.load %arg2[%c4_30, %c0_31, %c0_32] : memref<7x64x64xf32, #tpu.memory_space<vmem>>, vector<1x64x64xf32>
    %43 = vector.shape_cast %42 : vector<1x64x64xf32> to vector<64x64xf32>
    %cst_33 = arith.constant dense<0.000000e+00> : vector<8x64xf32>
    %44 = tpu.matmul %41, %43, %cst_33 {dimension_numbers = #tpu.dot_dimension_numbers<[1], [0], [0], [1], [0, 0, 1, 1], [], []>} : vector<8x64xf32>, vector<64x64xf32>, vector<8x64xf32> -> vector<8x64xf32>
    %c5 = arith.constant 5 : index
    %c0_34 = arith.constant 0 : index
    %45 = vector.load %arg4[%c5, %c0_34] : memref<9x64xf32, #tpu.memory_space<vmem>>, vector<1x64xf32>
    %46 = vector.broadcast %45 : vector<1x64xf32> to vector<8x64xf32>
    %47 = arith.addf %44, %46 : vector<8x64xf32>
    %cst_35 = arith.constant 0.000000e+00 : f32
    %48 = vector.broadcast %cst_35 : f32 to vector<8x64xf32>
    %49 = arith.maximumf %47, %48 : vector<8x64xf32>
    %c5_36 = arith.constant 5 : index
    %c0_37 = arith.constant 0 : index
    %c0_38 = arith.constant 0 : index
    %50 = vector.load %arg2[%c5_36, %c0_37, %c0_38] : memref<7x64x64xf32, #tpu.memory_space<vmem>>, vector<1x64x64xf32>
    %51 = vector.shape_cast %50 : vector<1x64x64xf32> to vector<64x64xf32>
    %cst_39 = arith.constant dense<0.000000e+00> : vector<8x64xf32>
    %52 = tpu.matmul %49, %51, %cst_39 {dimension_numbers = #tpu.dot_dimension_numbers<[1], [0], [0], [1], [0, 0, 1, 1], [], []>} : vector<8x64xf32>, vector<64x64xf32>, vector<8x64xf32> -> vector<8x64xf32>
    %c6 = arith.constant 6 : index
    %c0_40 = arith.constant 0 : index
    %53 = vector.load %arg4[%c6, %c0_40] : memref<9x64xf32, #tpu.memory_space<vmem>>, vector<1x64xf32>
    %54 = vector.broadcast %53 : vector<1x64xf32> to vector<8x64xf32>
    %55 = arith.addf %52, %54 : vector<8x64xf32>
    %cst_41 = arith.constant 0.000000e+00 : f32
    %56 = vector.broadcast %cst_41 : f32 to vector<8x64xf32>
    %57 = arith.maximumf %55, %56 : vector<8x64xf32>
    %c6_42 = arith.constant 6 : index
    %c0_43 = arith.constant 0 : index
    %c0_44 = arith.constant 0 : index
    %58 = vector.load %arg2[%c6_42, %c0_43, %c0_44] : memref<7x64x64xf32, #tpu.memory_space<vmem>>, vector<1x64x64xf32>
    %59 = vector.shape_cast %58 : vector<1x64x64xf32> to vector<64x64xf32>
    %cst_45 = arith.constant dense<0.000000e+00> : vector<8x64xf32>
    %60 = tpu.matmul %57, %59, %cst_45 {dimension_numbers = #tpu.dot_dimension_numbers<[1], [0], [0], [1], [0, 0, 1, 1], [], []>} : vector<8x64xf32>, vector<64x64xf32>, vector<8x64xf32> -> vector<8x64xf32>
    %c7 = arith.constant 7 : index
    %c0_46 = arith.constant 0 : index
    %61 = vector.load %arg4[%c7, %c0_46] : memref<9x64xf32, #tpu.memory_space<vmem>>, vector<1x64xf32>
    %62 = vector.broadcast %61 : vector<1x64xf32> to vector<8x64xf32>
    %63 = arith.addf %60, %62 : vector<8x64xf32>
    %cst_47 = arith.constant 0.000000e+00 : f32
    %64 = vector.broadcast %cst_47 : f32 to vector<8x64xf32>
    %65 = arith.maximumf %63, %64 : vector<8x64xf32>
    %66 = arith.addf %57, %65 : vector<8x64xf32>
    %c8 = arith.constant 8 : index
    %c0_48 = arith.constant 0 : index
    %67 = vector.load %arg4[%c8, %c0_48] : memref<9x64xf32, #tpu.memory_space<vmem>>, vector<1x64xf32>
    %68 = vector.extract_strided_slice %67 {offsets = [0, 0], sizes = [1, 12], strides = [1, 1]} : vector<1x64xf32> to vector<1x12xf32>
    %c0_49 = arith.constant 0 : index
    %c0_50 = arith.constant 0 : index
    %69 = vector.load %arg3[%c0_49, %c0_50] : memref<64x12xf32, #tpu.memory_space<vmem>>, vector<64x12xf32>
    %cst_51 = arith.constant dense<0.000000e+00> : vector<8x12xf32>
    %70 = tpu.matmul %66, %69, %cst_51 {dimension_numbers = #tpu.dot_dimension_numbers<[1], [0], [0], [1], [0, 0, 1, 1], [], []>} : vector<8x64xf32>, vector<64x12xf32>, vector<8x12xf32> -> vector<8x12xf32>
    %71 = vector.broadcast %68 : vector<1x12xf32> to vector<8x12xf32>
    %72 = arith.addf %70, %71 : vector<8x12xf32>
    %73 = vector.extract_strided_slice %72 {offsets = [0, 0], sizes = [8, 6], strides = [1, 1]} : vector<8x12xf32> to vector<8x6xf32>
    %74 = vector.extract_strided_slice %72 {offsets = [0, 6], sizes = [8, 6], strides = [1, 1]} : vector<8x12xf32> to vector<8x6xf32>
    %75 = arith.minimumf %73, %74 : vector<8x6xf32>
    %c0_52 = arith.constant 0 : index
    %c0_53 = arith.constant 0 : index
    %76 = vector.load %arg5[%c0_52, %c0_53] : memref<8x6xf32, #tpu.memory_space<vmem>>, vector<8x6xf32>
    tpu.vector_store %arg5[%c0_52, %c0_53], %75 {strides = array<i32>} : memref<8x6xf32, #tpu.memory_space<vmem>>, vector<8x6xf32>,
    return
  }
}

</mosaic_0001>

<bundles_post_ra>
// kernel: tpu_custom_call.1
= control target key start
LH: loop header
LB: loop body
LE: loop exit
PB: predicated region body
PF: predicated region fallthrough
CT: control target
= control target key end

     0   :  { %10 = vsyncpa [#allocation3], 0  ;;  %s1433_s0 = inlined_call_operand.vmem [shape: f32[8,16], index: 0, kind: input, shape index: {}]   ;;  %s1434_s1 = inlined_call_operand.vmem [shape: f32[16,64], index: 1, kind: input, shape index: {}]   ;;  %s1435_s2 = inlined_call_operand.hbm [shape: f32[7,64,64], index: 2, kind: input, shape index: {}]   ;;  %s1436_s3 = inlined_call_operand.vmem [shape: f32[64,12], index: 3, kind: input, shape index: {}]   ;;  %s1437_s4 = inlined_call_operand.vmem [shape: f32[9,64], index: 4, kind: input, shape index: {}]   ;;  %s1438_s5 = inlined_call_operand.hbm [shape: f32[8,6], index: 5, kind: output, shape index: {}]  }
   0x1   :  { %11 = vsyncpa [#allocation4], 0  ;;  %s1252_s18 = smov [#allocation2]   ;;  %s1204_s22 = scalar_lea.hbm %s1435_s2, 7168 }
   0x2   :  { %s21_s19 = sshll.u32 %s1252_s18, 4  ;;  %p1205_p0 = scmp.ne.s32.totalorder %s1435_s2, %s1204_s22  ;;  %s22_s19 = int_to_ptr.vmem [resolvable:$true] %s21_s19 }
   0x3   :  { %p1208_p1 = scmp.lt.u32.totalorder %s1204_s22, %s1435_s2 }
   0x5   :  { %p1210_p2 = pnand %p1208_p1, %p1205_p0 }
   0x7   :  { %1213 = shalt.err (!%p1210_p2)
}
   0x8   :  { %s1214_s27 = scalar_lea.vmem %s22_s19, 7168  ;;  %p1219_p4 = scmp.lt.s32.totalorder %s22_s19, %s22_s19 }
   0x9   :  { %p1215_p3 = scmp.ne.s32.totalorder %s22_s19, %s1214_s27  ;;  %p1220_p5 = scmp.lt.s32.totalorder %s1214_s27, %s1214_s27 }
   0xb   :  { %p1221_p6 = por %p1220_p5, %p1219_p4 }
   0xd   :  { %p1222_p7 = pnand %p1221_p6, %p1215_p3 }
   0xf   :  { %1225 = shalt.err (!%p1222_p7)
}
  0x10   :  { %s1253_s28 = smov 128   ;;  %s1254_s29 = smov 8  }
  0x11   :  { %27 = dma.hbm_to_vmem [thread:$0]  %s1435_s2, 7168, %s22_s19, [#allocation3], %s1253_s28, %s1253_s28, %s1254_s29  }
  0x12   :  { %1248 = dma.done.wait [#allocation3], 7168  }
  0x13   :  { %1249 = vsyncadd [#allocation3], 4294960128  ;;  %v1255_v0 = vmov 0.0|0.0   ;;  %vm1256_vm0 = vmmov 0   ;;  %v1257_v1 = vmov 0.0   ;;  %v36_v2 = vld [vmem:[%s1434_s1] sm:$0xff] }
  0x14   :  { %1097 = vmatprep.subr.bf16.mxu0 %v1255_v0  ;;  %942 = vmatprep.mubr.msk.f32.mxu0 %vm1256_vm0, %v1257_v1  ;;  %v37_v3 = vld [vmem:[%s1434_s1 + $0x8] sm:$0xff]  ;;  %v118_v5 = vld [vmem:[#allocation2] sm:$0xff]  ;;  %v120_v7 = vld [vmem:[#allocation2 + $0x10] sm:$0xff]  ;;  %vm43_vm1 = vcmask 130048   ;;  %vm131_vm2 = vcmask 523264   ;;  %s1259_s16 = smov [#allocation5]  }
  0x15   :  { %1100 = vmatprep.subr.bf16.mxu1 %v1255_v0  ;;  %961 = vmatprep.mubr.msk.f32.mxu1 %vm1256_vm0, %v1257_v1  ;;  %v1098_v4 = vpack.c.bf16 %v37_v3, %v36_v2  ;;  %v119_v6 = vld [vmem:[#allocation2 + $0x8] sm:$0xff]  ;;  %v121_v9 = vld [vmem:[#allocation2 + $0x18] sm:$0xff]  ;;  %v35_v10 = vld [vmem:[%s1433_s0] sm:$0xff]  ;;  %s836_s17 = sshll.u32 %s1259_s16, 4  ;;  %vm828_vm3 = vcmask 48128   ;;  %s837_s17 = int_to_ptr.vmem [resolvable:$true] %s836_s17 }
  0x16   :  { %v1101_v8 = vpack.c.bf16 %v119_v6, %v118_v5  ;;  %v1104_v11 = vpack.c.bf16 %v121_v9, %v120_v7  ;;  %v122_v12 = vld [vmem:[#allocation2 + $0x20] sm:$0xff]  ;;  %v123_v13 = vld [vmem:[#allocation2 + $0x28] sm:$0xff]  ;;  %v124_v15 = vld [vmem:[#allocation2 + $0x30] sm:$0xff]  ;;  %s1226_s18 = scalar_lea.vmem %s837_s17, 128  ;;  %p1231_p9 = scmp.lt.s32.totalorder %s837_s17, %s837_s17 }
  0x17   :  { %1099 = vmatpush3.bf16.msra.mxu0 %v1098_v4  ;;  %v1107_v14 = vpack.c.bf16 %v123_v13, %v122_v12  ;;  %v125_v16 = vld [vmem:[#allocation2 + $0x38] sm:$0xff]  ;;  %v208_v18 = vld [vmem:[#allocation2 + $0x40] sm:$0xff]  ;;  %v209_v19 = vld [vmem:[#allocation2 + $0x48] sm:$0xff]  ;;  %p1227_p8 = scmp.ne.s32.totalorder %s837_s17, %s1226_s18  ;;  %p1232_p10 = scmp.lt.s32.totalorder %s1226_s18, %s1226_s18 }
  0x18   :  { %1102 = vmatpush3.bf16.msra.mxu1 %v1101_v8  ;;  %1112 = vmatprep.subr.bf16.mxu0 %v1255_v0  ;;  %v1110_v17 = vpack.c.bf16 %v125_v16, %v124_v15  ;;  %v210_v20 = vld [vmem:[#allocation2 + $0x50] sm:$0xff]  ;;  %v1113_v21 = vpack.c.bf16 %v209_v19, %v208_v18  ;;  %v211_v22 = vld [vmem:[#allocation2 + $0x58] sm:$0xff]  ;;  %v845_v24 = vld [vmem:[%s1437_s4] ss:$0 sm:$0xff] }
  0x19   :  { %1103 = vmatprep.subr.bf16.mxu1 %v1255_v0  ;;  %v1116_v23 = vpack.c.bf16 %v211_v22, %v210_v20  ;;  %v212_v29 = vld [vmem:[#allocation2 + $0x60] sm:$0xff]  ;;  %v213_v30 = vld [vmem:[#allocation2 + $0x68] sm:$0xff]  ;;  %v214_v32 = vld [vmem:[#allocation2 + $0x70] sm:$0xff]  ;;  %p1233_p11 = por %p1232_p10, %p1231_p9 }
  0x1a   :  { %943 = vmatmul.mubr.msk.f32.vlgmr.msra.gmra.mrb[0].mxu0 %vm43_vm1, %v35_v10  ;;  %v1119_v31 = vpack.c.bf16 %v213_v30, %v212_v29  ;;  %v215_v33 = vld [vmem:[#allocation2 + $0x78] sm:$0xff]  ;;  %v296_v35 = vld [vmem:[#allocation2 + $0x80] sm:$0xff]  ;;  %v297_v36 = vld [vmem:[#allocation2 + $0x88] sm:$0xff] }
  0x1b   :  { %980 = vmatprep.mubr.msk.f32.mxu0 %vm1256_vm0, %v1257_v1  ;;  %1114 = vmatpush3.bf16.msra.mxu0 %v1113_v21  ;;  %v1122_v34 = vpack.c.bf16 %v215_v33, %v214_v32  ;;  %v298_v37 = vld [vmem:[#allocation2 + $0x90] sm:$0xff]  ;;  %v1125_v38 = vpack.c.bf16 %v297_v36, %v296_v35  ;;  %v299_v39 = vld [vmem:[#allocation2 + $0x98] sm:$0xff]  ;;  %v300_v41 = vld [vmem:[#allocation2 + $0xa0] sm:$0xff]  ;;  %p1234_p12 = pnand %p1233_p11, %p1227_p8 }
  0x1c   :  { %1105 = vmatpush3.bf16.msra.mxu1 %v1104_v11  ;;  %1115 = vmatprep.subr.bf16.mxu0 %v1255_v0  ;;  %v1128_v40 = vpack.c.bf16 %v299_v39, %v298_v37  ;;  %v301_v42 = vld [vmem:[#allocation2 + $0xa8] sm:$0xff]  ;;  %v847_v44 = vld [vmem:[%s1437_s4 + $0x1] ss:$0 sm:$0xff]  ;;  %v302_v50 = vld [vmem:[#allocation2 + $0xb0] sm:$0xff] }
  0x1d   :  { %1106 = vmatprep.subr.bf16.mxu1 %v1255_v0  ;;  %v1131_v43 = vpack.c.bf16 %v301_v42, %v300_v41  ;;  %v303_v51 = vld [vmem:[#allocation2 + $0xb8] sm:$0xff]  ;;  %v384_v53 = vld [vmem:[#allocation2 + $0xc0] sm:$0xff]  ;;  %v385_v54 = vld [vmem:[#allocation2 + $0xc8] sm:$0xff] }
  0x1e   :  { %v1134_v52 = vpack.c.bf16 %v303_v51, %v302_v50  ;;  %v386_v55 = vld [vmem:[#allocation2 + $0xd0] sm:$0xff]  ;;  %v1137_v56 = vpack.c.bf16 %v385_v54, %v384_v53  ;;  %v387_v57 = vld [vmem:[#allocation2 + $0xd8] sm:$0xff]  ;;  %v388_v59 = vld [vmem:[#allocation2 + $0xe0] sm:$0xff] }
  0x1f   :  { %1117 = vmatpush3.bf16.msra.mxu0 %v1116_v23  ;;  %v1140_v58 = vpack.c.bf16 %v387_v57, %v386_v55  ;;  %v389_v60 = vld [vmem:[#allocation2 + $0xe8] sm:$0xff]  ;;  %v849_v62 = vld [vmem:[%s1437_s4 + $0x2] ss:$0 sm:$0xff]  ;;  %v390_v5 = vld [vmem:[#allocation2 + $0xf0] sm:$0xff] }
  0x20   :  { %1108 = vmatpush3.bf16.msra.mxu1 %v1107_v14  ;;  %1118 = vmatprep.subr.bf16.mxu0 %v1255_v0  ;;  %v1143_v61 = vpack.c.bf16 %v389_v60, %v388_v59  ;;  %v391_v6 = vld [vmem:[#allocation2 + $0xf8] sm:$0xff]  ;;  %v473_v8 = vld [vmem:[#allocation2 + $0x100] sm:$0xff]  ;;  %v474_v9 = vld [vmem:[#allocation2 + $0x108] sm:$0xff] }
  0x21   :  { %1109 = vmatprep.subr.bf16.mxu1 %v1255_v0  ;;  %v1146_v7 = vpack.c.bf16 %v391_v6, %v390_v5  ;;  %v475_v10 = vld [vmem:[#allocation2 + $0x110] sm:$0xff]  ;;  %v1149_v11 = vpack.c.bf16 %v474_v9, %v473_v8  ;;  %v476_v12 = vld [vmem:[#allocation2 + $0x118] sm:$0xff]  ;;  %v851_v14 = vld [vmem:[%s1437_s4 + $0x3] ss:$0 sm:$0xff] }
  0x22   :  { %v1152_v13 = vpack.c.bf16 %v476_v12, %v475_v10  ;;  %v477_v19 = vld [vmem:[#allocation2 + $0x120] sm:$0xff]  ;;  %v478_v20 = vld [vmem:[#allocation2 + $0x128] sm:$0xff]  ;;  %v479_v22 = vld [vmem:[#allocation2 + $0x130] sm:$0xff] }
  0x23   :  { %1120 = vmatpush3.bf16.msra.mxu0 %v1119_v31  ;;  %v1155_v21 = vpack.c.bf16 %v478_v20, %v477_v19  ;;  %v480_v23 = vld [vmem:[#allocation2 + $0x138] sm:$0xff]  ;;  %v565_v31 = vld [vmem:[#allocation2 + $0x160] sm:$0xff]  ;;  %v566_v32 = vld [vmem:[#allocation2 + $0x168] sm:$0xff] }
  0x24   :  { %1111 = vmatpush3.bf16.msra.mxu1 %v1110_v17  ;;  %1121 = vmatprep.subr.bf16.mxu0 %v1255_v0  ;;  %v564_v29 = vld [vmem:[#allocation2 + $0x158] sm:$0xff]  ;;  %v1167_v33 = vpack.c.bf16 %v566_v32, %v565_v31  ;;  %v654_v50 = vld [vmem:[#allocation2 + $0x1a8] sm:$0xff]  ;;  %v655_v57 = vld [vmem:[#allocation2 + $0x1b0] sm:$0xff] }
  0x25   :  { %1124 = vmatprep.subr.bf16.mxu1 %v1255_v0  ;;  %v568_v41 = vld [vmem:[#allocation2 + $0x178] sm:$0xff]  ;;  %v738_v60 = vld [vmem:[%s1436_s3] sm:$0xff]  ;;  %v743_v9 = vld [vmem:[%s1436_s3 + $0x28] sm:$0xff] }
  0x26   :  { %v742_v8 = vld [vmem:[%s1436_s3 + $0x20] sm:$0xff]  ;;  %v745_v12 = vld [vmem:[%s1436_s3 + $0x38] sm:$0xff] }
  0x27   :  { %1123 = vmatpush3.bf16.msra.mxu0 %v1122_v34  ;;  %v853_v34 = vld [vmem:[%s1437_s4 + $0x4] ss:$0 sm:$0xff]  ;;  %v1191_v10 = vpack.c.bf16 %v743_v9, %v742_v8 }
  0x28   :  { %1136 = vmatprep.subr.bf16.mxu0 %v1255_v0 }
  0xed   :  { %v113_v25 = vpop.f32.mrb[0].mxu0 }
  0xee   :  { %v114_v26 = vadd.f32 %v845_v24, %v113_v25  ;;  %v944_v27 = vpop.f32.mrb[1].mxu0  ;;  %v1158_v24 = vpack.c.bf16 %v480_v23, %v479_v22  ;;  %v561_v25 = vld [vmem:[#allocation2 + $0x140] sm:$0xff] }
  0xef   :  { %v563_v27 = vld [vmem:[#allocation2 + $0x150] sm:$0xff] }
  0xf0   :  { %v117_v28 = vmax.f32 %v114_v26, 0.0  ;;  %v562_v26 = vld [vmem:[#allocation2 + $0x148] sm:$0xff]  ;;  %v1164_v30 = vpack.c.bf16 %v564_v29, %v563_v27 }
  0xf2   :  { %962 = vmatmul.mubr.msk.f32.vlgmr.msra.gmra.mrb[0].mxu1 %vm131_vm2, %v117_v28 }
  0xf3   :  { %999 = vmatprep.mubr.msk.f32.mxu1 %vm1256_vm0, %v1257_v1  ;;  %1126 = vmatpush3.bf16.msra.mxu1 %v1125_v38 }
  0xf4   :  { %1127 = vmatprep.subr.bf16.mxu1 %v1255_v0 }
  0xf7   :  { %1129 = vmatpush3.bf16.msra.mxu1 %v1128_v40  ;;  %v567_v40 = vld [vmem:[#allocation2 + $0x170] sm:$0xff] }
  0xf8   :  { %1130 = vmatprep.subr.bf16.mxu1 %v1255_v0  ;;  %v1170_v42 = vpack.c.bf16 %v568_v41, %v567_v40 }
  0xfb   :  { %1132 = vmatpush3.bf16.msra.mxu1 %v1131_v43  ;;  %v649_v43 = vld [vmem:[#allocation2 + $0x180] sm:$0xff] }
  0xfc   :  { %1133 = vmatprep.subr.bf16.mxu1 %v1255_v0 }
  0xff   :  { %1135 = vmatpush3.bf16.msra.mxu1 %v1134_v52  ;;  %v855_v52 = vld [vmem:[%s1437_s4 + $0x5] ss:$0 sm:$0xff] }
 0x100   :  { %1148 = vmatprep.subr.bf16.mxu1 %v1255_v0 }
 0x1c5   :  { %v201_v45 = vpop.f32.mrb[0].mxu1 }
 0x1c6   :  { %v202_v46 = vadd.f32 %v847_v44, %v201_v45  ;;  %v963_v47 = vpop.f32.mrb[1].mxu1  ;;  %v650_v44 = vld [vmem:[#allocation2 + $0x188] sm:$0xff]  ;;  %v651_v45 = vld [vmem:[#allocation2 + $0x190] sm:$0xff] }
 0x1c7   :  { %v652_v47 = vld [vmem:[#allocation2 + $0x198] sm:$0xff] }
 0x1c8   :  { %v205_v48 = vmax.f32 %v202_v46, 0.0  ;;  %v1173_v46 = vpack.c.bf16 %v650_v44, %v649_v43 }
 0x1ca   :  { %v206_v49 = vadd.f32 %v205_v48, %v117_v28  ;;  %v1161_v28 = vpack.c.bf16 %v562_v26, %v561_v25  ;;  %v1176_v48 = vpack.c.bf16 %v652_v47, %v651_v45 }
 0x1cc   :  { %981 = vmatmul.mubr.msk.f32.vlgmr.msra.gmra.mrb[2].mxu0 %vm131_vm2, %v206_v49  ;;  %v653_v49 = vld [vmem:[#allocation2 + $0x1a0] sm:$0xff] }
 0x1cd   :  { %1018 = vmatprep.mubr.msk.f32.mxu0 %vm1256_vm0, %v1257_v1  ;;  %1138 = vmatpush3.bf16.msra.mxu0 %v1137_v56  ;;  %v1179_v51 = vpack.c.bf16 %v654_v50, %v653_v49 }
 0x1ce   :  { %1139 = vmatprep.subr.bf16.mxu0 %v1255_v0 }
 0x1d1   :  { %1141 = vmatpush3.bf16.msra.mxu0 %v1140_v58  ;;  %v656_v58 = vld [vmem:[#allocation2 + $0x1b8] sm:$0xff] }
 0x1d2   :  { %1142 = vmatprep.subr.bf16.mxu0 %v1255_v0  ;;  %v1182_v59 = vpack.c.bf16 %v656_v58, %v655_v57 }
 0x1d5   :  { %1144 = vmatpush3.bf16.msra.mxu0 %v1143_v61  ;;  %v739_v61 = vld [vmem:[%s1436_s3 + $0x8] sm:$0xff] }
 0x1d6   :  { %1145 = vmatprep.subr.bf16.mxu0 %v1255_v0 }
 0x1d9   :  { %1147 = vmatpush3.bf16.msra.mxu0 %v1146_v7 }
 0x1da   :  { %1160 = vmatprep.subr.bf16.mxu0 %v1255_v0 }
 0x29f   :  { %v290_v63 = vpop.f32.mrb[2].mxu0 }
 0x2a0   :  { %v291_v2 = vadd.f32 %v849_v62, %v290_v63  ;;  %v982_v3 = vpop.f32.mrb[3].mxu0  ;;  %v740_v62 = vld [vmem:[%s1436_s3 + $0x10] sm:$0xff]  ;;  %v1185_v63 = vpack.c.bf16 %v739_v61, %v738_v60 }
 0x2a1   :  { %v857_v3 = vld [vmem:[%s1437_s4 + $0x6] ss:$0 sm:$0xff] }
 0x2a2   :  { %v294_v4 = vmax.f32 %v291_v2, 0.0 }
 0x2a4   :  { %1000 = vmatmul.mubr.msk.f32.vlgmr.msra.gmra.mrb[2].mxu1 %vm131_vm2, %v294_v4 }
 0x2a5   :  { %1037 = vmatprep.mubr.msk.f32.mxu1 %vm1256_vm0, %v1257_v1  ;;  %1150 = vmatpush3.bf16.msra.mxu1 %v1149_v11  ;;  %v744_v11 = vld [vmem:[%s1436_s3 + $0x30] sm:$0xff] }
 0x2a6   :  { %1151 = vmatprep.subr.bf16.mxu1 %v1255_v0 }
 0x2a9   :  { %1153 = vmatpush3.bf16.msra.mxu1 %v1152_v13  ;;  %v1194_v13 = vpack.c.bf16 %v745_v12, %v744_v11 }
 0x2aa   :  { %1154 = vmatprep.subr.bf16.mxu1 %v1255_v0 }
 0x2ad   :  { %1156 = vmatpush3.bf16.msra.mxu1 %v1155_v21 }
 0x2ae   :  { %1157 = vmatprep.subr.bf16.mxu1 %v1255_v0 }
 0x2b1   :  { %1159 = vmatpush3.bf16.msra.mxu1 %v1158_v24 }
 0x2b2   :  { %1172 = vmatprep.subr.bf16.mxu1 %v1255_v0 }
 0x377   :  { %v378_v15 = vpop.f32.mrb[2].mxu1 }
 0x378   :  { %v379_v16 = vadd.f32 %v851_v14, %v378_v15  ;;  %v1001_v17 = vpop.f32.mrb[3].mxu1  ;;  %v859_v14 = vld [vmem:[%s1437_s4 + $0x7] ss:$0 sm:$0xff] }
 0x37a   :  { %v382_v18 = vmax.f32 %v379_v16, 0.0 }
 0x37c   :  { %1019 = vmatmul.mubr.msk.f32.vlgmr.msra.gmra.mrb[4].mxu0 %vm131_vm2, %v382_v18 }
 0x37d   :  { %1056 = vmatprep.mubr.msk.f32.mxu0 %vm1256_vm0, %v1257_v1  ;;  %1162 = vmatpush3.bf16.msra.mxu0 %v1161_v28 }
 0x37e   :  { %1163 = vmatprep.subr.bf16.mxu0 %v1255_v0 }
 0x381   :  { %1165 = vmatpush3.bf16.msra.mxu0 %v1164_v30 }
 0x382   :  { %1166 = vmatprep.subr.bf16.mxu0 %v1255_v0 }
 0x385   :  { %1168 = vmatpush3.bf16.msra.mxu0 %v1167_v33 }
 0x386   :  { %1169 = vmatprep.subr.bf16.mxu0 %v1255_v0 }
 0x389   :  { %1171 = vmatpush3.bf16.msra.mxu0 %v1170_v42 }
 0x38a   :  { %1184 = vmatprep.subr.bf16.mxu0 %v1255_v0 }
 0x44f   :  { %v466_v35 = vpop.f32.mrb[4].mxu0 }
 0x450   :  { %v467_v36 = vadd.f32 %v853_v34, %v466_v35  ;;  %v1020_v37 = vpop.f32.mrb[5].mxu0 }
 0x452   :  { %v470_v38 = vmax.f32 %v467_v36, 0.0 }
 0x454   :  { %v471_v39 = vadd.f32 %v470_v38, %v382_v18 }
 0x456   :  { %1038 = vmatmul.mubr.msk.f32.vlgmr.msra.gmra.mrb[4].mxu1 %vm131_vm2, %v471_v39 }
 0x457   :  { %1075 = vmatprep.mubr.msk.f32.mxu1 %vm1256_vm0, %v1257_v1  ;;  %1174 = vmatpush3.bf16.msra.mxu1 %v1173_v46 }
 0x458   :  { %1175 = vmatprep.subr.bf16.mxu1 %v1255_v0 }
 0x45b   :  { %1177 = vmatpush3.bf16.msra.mxu1 %v1176_v48 }
 0x45c   :  { %1178 = vmatprep.subr.bf16.mxu1 %v1255_v0 }
 0x45f   :  { %1180 = vmatpush3.bf16.msra.mxu1 %v1179_v51 }
 0x460   :  { %1181 = vmatprep.subr.bf16.mxu1 %v1255_v0 }
 0x463   :  { %1183 = vmatpush3.bf16.msra.mxu1 %v1182_v59 }
 0x529   :  { %v555_v53 = vpop.f32.mrb[4].mxu1 }
 0x52a   :  { %v556_v54 = vadd.f32 %v855_v52, %v555_v53  ;;  %v1039_v55 = vpop.f32.mrb[5].mxu1 }
 0x52c   :  { %v559_v56 = vmax.f32 %v556_v54, 0.0 }
 0x52e   :  { %1057 = vmatmul.mubr.msk.f32.vlgmr.msra.gmra.mrb[6].mxu0 %vm131_vm2, %v559_v56 }
 0x52f   :  { %1094 = vmatprep.mubr.msk.f32.mxu0 %vm1256_vm0, %v1257_v1  ;;  %v741_v1 = vld [vmem:[%s1436_s3 + $0x18] sm:$0xff]  ;;  %1186 = vmatpush3.bf16.msra.mxu0 %v1185_v63  ;;  %s1258_s3 = smov 122  }
 0x530   :  { %v1188_v2 = vpack.c.bf16 %v741_v1, %v740_v62  ;;  %1187 = vmatprep.subr.bf16.mxu0 %v1255_v0 }
 0x533   :  { %1189 = vmatpush3.bf16.msra.mxu0 %v1188_v2 }
 0x534   :  { %1190 = vmatprep.subr.bf16.mxu0 %v1255_v0 }
 0x537   :  { %1192 = vmatpush3.bf16.msra.mxu0 %v1191_v10 }
 0x538   :  { %1193 = vmatprep.subr.bf16.mxu0 %v1255_v0  ;;  %v861_v0 = vld [vmem:[%s1437_s4 + $0x8] ss:$0 sm:$0xff] }
 0x53b   :  { %1195 = vmatpush3.bf16.msra.mxu0 %v1194_v13 }
 0x601   :  { %v643_v4 = vpop.f32.mrb[6].mxu0 }
 0x602   :  { %v644_v5 = vadd.f32 %v857_v3, %v643_v4  ;;  %v1058_v6 = vpop.f32.mrb[7].mxu0 }
 0x604   :  { %v647_v7 = vmax.f32 %v644_v5, 0.0 }
 0x606   :  { %1076 = vmatmul.mubr.msk.f32.vlgmr.msra.gmra.mrb[6].mxu1 %vm131_vm2, %v647_v7 }
 0x6d9   :  { %v731_v15 = vpop.f32.mrb[6].mxu1 }
 0x6da   :  { %v732_v16 = vadd.f32 %v859_v14, %v731_v15  ;;  %v1077_v17 = vpop.f32.mrb[7].mxu1 }
 0x6dc   :  { %v735_v18 = vmax.f32 %v732_v16, 0.0 }
 0x6de   :  { %v736_v19 = vadd.f32 %v735_v18, %v647_v7 }
 0x6e0   :  { %1095 = vmatmul.mubr.msk.f32.vlgmr.msra.gmra.mrb[8].mxu0 %vm131_vm2, %v736_v19 }
 0x7b3   :  { %v819_v20 = vpop.f32.mrb[8].mxu0 }
 0x7b4   :  { %v820_v21 = vadd.f32 %v861_v0, %v819_v20  ;;  %v1096_v22 = vpop.f32.mrb[9].mxu0 }
 0x7b6   :  { %824 = vrot.lane.b32.xlu0 %v820_v21, %s1258_s3 }
 0x828   :  { %v825_v23 = vpop.permute.xlu0 %824 }
 0x829   :  { %v827_v24 = vmin.f32 %v820_v21, %v825_v23 }
 0x82b   :  { %829 = vst.msk [vmem:[#allocation5] sm:$0xff] %vm828_vm3, %v827_v24 }
 0x82c   :  { %1237 = shalt.err (!%p1234_p12)
}
 0x82d   :  { %s1238_s20 = scalar_lea.hbm %s1438_s5, 128 }
 0x82e   :  { %p1239_p13 = scmp.ne.s32.totalorder %s1438_s5, %s1238_s20  ;;  %p1242_p0 = scmp.lt.u32.totalorder %s1238_s20, %s1438_s5 }
 0x830   :  { %p1244_p1 = pnand %p1242_p0, %p1239_p13 }
 0x832   :  { %1247 = shalt.err (!%p1244_p1)
}
 0x833   :  { %839 = dma.vmem_to_hbm [thread:$0]  %s837_s17, 128, %s1438_s5, [#allocation4]  }
 0x834   :  { %1250 = dma.done.wait [#allocation4], 128  }
 0x835   :  { %1251 = vsyncadd [#allocation4], 4294967168 }
 0x836   :  { %843 = vsyncpa [#allocation3], 1 }
 0x837   :  { %844 = vsyncpa [#allocation4], 1 }

</bundles_post_ra>
